<compile_context>
chip_gen: v7x
topology: tpu7x:2x2x1
jax: 0.10.0
libtpu: 0.0.40
codegen_flags: <defaults>
</compile_context>

<pallas_src>
import math

import jax
import jax.numpy as jnp
from jax.experimental import pallas as pl
from jax.experimental.pallas import tpu as pltpu


def _round_up(x: int, m: int) -> int:
    return ((x + m - 1) // m) * m


# ---------- Stage 1: combine = x @ W^T (F.linear) and combine^T --------------
def _linear_kernel(x_ref, w_ref, c_ref, ct_ref):
    x = x_ref[...]
    w = w_ref[...]
    # combine = x @ W^T  (contract last dims of both operands)
    c = jax.lax.dot_general(
        x, w, dimension_numbers=(((1,), (1,)), ((), ())),
        preferred_element_type=jnp.float32)
    # combine^T = W @ x^T, computed directly as a second tiny matmul
    # (avoids emitting an explicit in-kernel transpose op).
    ct = jax.lax.dot_general(
        w, x, dimension_numbers=(((1,), (1,)), ((), ())),
        preferred_element_type=jnp.float32)
    c_ref[...] = c
    ct_ref[...] = ct


# ---------- Stage 2: adj tile = sigmoid(C_i @ (C^T)_j) -----------------------
def _gram_sigmoid_kernel(ci_ref, cjt_ref, adj_ref):
    logits = jax.lax.dot_general(
        ci_ref[...], cjt_ref[...],
        dimension_numbers=(((1,), (0,)), ((), ())),   # standard (M,K)x(K,N)
        preferred_element_type=jnp.float32)
    # sigmoid(x) = 0.5 * (1 + tanh(x/2)): single EUP transcendental per element.
    adj = 0.5 * (1.0 + jnp.tanh(0.5 * logits))
    adj_ref[...] = adj.astype(adj_ref.dtype)


def _decoder_forward_pallas(node_embed, de_weight, *, tile, out_dtype):
    n, h = node_embed.shape
    x = node_embed.astype(jnp.float32)
    w = de_weight.astype(jnp.float32)

    if n < 128:
        # Tiny problem: single full-array block, no padding at all.
        tile_eff = n
        n_pad = n
    else:
        tile_eff = max(128, min(_round_up(tile, 128), _round_up(n, 128)))
        n_pad = _round_up(n, tile_eff)
        if n_pad != n:
            # Zero-pad rows of x only (O(N*H)); padded rows never reach the
            # returned adjacency because stage-2 edge-block writes are clipped.
            x = jnp.pad(x, ((0, n_pad - n), (0, 0)))
    n_blocks = n_pad // tile_eff

    # ---- Stage 1: combine (N_pad, H) and combine^T (H, N_pad), both f32 -----
    combine, combine_t = pl.pallas_call(
        _linear_kernel,
        out_shape=(jax.ShapeDtypeStruct((n_pad, h), jnp.float32),
                   jax.ShapeDtypeStruct((h, n_pad), jnp.float32)),
        grid=(n_blocks,),
        in_specs=[pl.BlockSpec((tile_eff, h), lambda i: (i, 0)),
                  pl.BlockSpec((h, h), lambda i: (0, 0))],
        out_specs=(pl.BlockSpec((tile_eff, h), lambda i: (i, 0)),
                   pl.BlockSpec((h, tile_eff), lambda i: (0, i))),
        compiler_params=pltpu.CompilerParams(
            dimension_semantics=("parallel",)),
    )(x, w)

    # ---- Stage 2: exact (N, N) adjacency, lane-dense tiles ------------------
    out_itemsize = jnp.dtype(out_dtype).itemsize
    cost = pl.CostEstimate(
        flops=2 * n_pad * n_pad * h,
        transcendentals=n_pad * n_pad,
        bytes_accessed=n * n * out_itemsize + 2 * n_blocks * n_pad * h * 4,
    )

    adj = pl.pallas_call(
        _gram_sigmoid_kernel,
        out_shape=jax.ShapeDtypeStruct((n, n), out_dtype),   # exact shape: no post-slice
        grid=(n_blocks, n_blocks),
        in_specs=[pl.BlockSpec((tile_eff, h), lambda i, j: (i, 0)),   # C row strip
                  pl.BlockSpec((h, tile_eff), lambda i, j: (0, j))],  # C^T col strip
        out_specs=pl.BlockSpec((tile_eff, tile_eff), lambda i, j: (i, j)),
        compiler_params=pltpu.CompilerParams(
            dimension_semantics=("parallel", "parallel"),
            vmem_limit_bytes=48 * 1024 * 1024),
        cost_estimate=cost,
    )(combine, combine_t)
    return adj


def decoder_forward(node_embed, de_weight, *, tile=1024, out_dtype=jnp.bfloat16):
    """GraphSMOTE Decoder forward. node_embed: (N, H), de_weight: (H, H).

    out_dtype=jnp.bfloat16 (default) halves the N^2 HBM writeback of the
    writeback-bound adjacency; pass jnp.float32 for exact PyTorch parity.
    """
    n, h = node_embed.shape
    assert de_weight.shape == (h, h)
    return _decoder_forward_pallas(node_embed, de_weight, tile=tile,
                                   out_dtype=out_dtype)


def decoder_reference(node_embed, de_weight):
    combine = jax.lax.dot_general(
        node_embed, de_weight, (((1,), (1,)), ((), ())),
        precision=jax.lax.Precision.HIGHEST)
    logits = jax.lax.dot_general(
        combine, combine, (((1,), (1,)), ((), ())),
        precision=jax.lax.Precision.HIGHEST)
    return jax.nn.sigmoid(logits)


if __name__ == "__main__":
    key = jax.random.PRNGKey(0)
    k_w, k1, k2, k3 = jax.random.split(key, 4)

    NHID = 32
    # Deterministic init mirroring reset_parameters(): uniform(-stdv, stdv),
    # stdv = 1/sqrt(nhid).
    stdv = 1.0 / math.sqrt(NHID)
    de_weight = jax.random.uniform(
        k_w, (NHID, NHID), dtype=jnp.float32, minval=-stdv, maxval=stdv)

    def run_check(name, n, k, *, tile, out_dtype, max_tol, mean_tol):
        x = jax.random.normal(k, (n, NHID), dtype=jnp.float32)
        adj = jax.block_until_ready(
            decoder_forward(x, de_weight, tile=tile, out_dtype=out_dtype))
        ref = decoder_reference(x, de_weight)
        assert adj.shape == (n, n), (name, adj.shape)
        assert adj.dtype == jnp.dtype(out_dtype), (name, adj.dtype)
        err = jnp.abs(adj.astype(jnp.float32) - ref)
        max_err = float(jnp.max(err))
        mean_err = float(jnp.mean(err))
        assert max_err < max_tol, f"{name}: max err {max_err}"
        assert mean_err < mean_tol, f"{name}: mean err {mean_err}"

    # 1) Module-sized small input: single full-array block, exact f32 output.
    run_check("small_f32", 8, k1, tile=1024, out_dtype=jnp.float32,
              max_tol=2e-2, mean_tol=4e-3)

    # 2) Multi-tile grid with edge clipping (300 rows under a 3x3 grid of 128s),
    #    bf16 adjacency.
    run_check("mid_bf16", 300, k2, tile=128, out_dtype=jnp.bfloat16,
              max_tol=2.5e-2, mean_tol=4e-3)

    # 3) Default big-tile path with a non-tile-multiple N (1000 under 1024 tile),
    #    bf16 adjacency — exercises padding of the input and clipped edge writes.
    run_check("big_bf16", 1000, k3, tile=1024, out_dtype=jnp.bfloat16,
              max_tol=2.5e-2, mean_tol=4e-3)

    print("KERNEL_OK")
</pallas_src>

<mosaic_0001>
module attributes {stable_mosaic.version = 11 : i64} {
  func.func @_linear_kernel(%arg0: i32, %arg1: memref<8x32xf32, #tpu.memory_space<vmem>>, %arg2: memref<32x32xf32, #tpu.memory_space<vmem>>, %arg3: memref<8x32xf32, #tpu.memory_space<vmem>>, %arg4: memref<32x8xf32, #tpu.memory_space<vmem>>) attributes {dimension_semantics = [#tpu.dimension_semantics<parallel>], iteration_bounds = array<i64: 1>, scalar_prefetch = 0 : i64, scratch_operands = 0 : i64, tpu.core_type = #tpu.core_type<tc>, window_params = [{transform_indices = @transform_0, window_bounds = array<i64: 8, 32>}, {pipeline_mode = #tpu.pipeline_mode<synchronous>, transform_indices = @transform_1, window_bounds = array<i64: 32, 32>}, {transform_indices = @transform_2, window_bounds = array<i64: 8, 32>}, {transform_indices = @transform_3, window_bounds = array<i64: 32, 8>}]} {
    %c0 = arith.constant 0 : index
    %c0_0 = arith.constant 0 : index
    %0 = vector.load %arg1[%c0, %c0_0] : memref<8x32xf32, #tpu.memory_space<vmem>>, vector<8x32xf32>
    %c0_1 = arith.constant 0 : index
    %c0_2 = arith.constant 0 : index
    %1 = vector.load %arg2[%c0_1, %c0_2] : memref<32x32xf32, #tpu.memory_space<vmem>>, vector<32x32xf32>
    %cst = arith.constant dense<0.000000e+00> : vector<8x32xf32>
    %2 = tpu.matmul %0, %1, %cst {dimension_numbers = #tpu.dot_dimension_numbers<[1], [1], [0], [0], [0, 0, 1, 0], [], []>} : vector<8x32xf32>, vector<32x32xf32>, vector<8x32xf32> -> vector<8x32xf32>
    %cst_3 = arith.constant dense<0.000000e+00> : vector<32x8xf32>
    %3 = tpu.matmul %1, %0, %cst_3 {dimension_numbers = #tpu.dot_dimension_numbers<[1], [1], [0], [0], [0, 0, 1, 0], [], []>} : vector<32x32xf32>, vector<8x32xf32>, vector<32x8xf32> -> vector<32x8xf32>
    %c0_4 = arith.constant 0 : index
    %c0_5 = arith.constant 0 : index
    %4 = vector.load %arg3[%c0_4, %c0_5] : memref<8x32xf32, #tpu.memory_space<vmem>>, vector<8x32xf32>
    tpu.vector_store %arg3[%c0_4, %c0_5], %2 {strides = array<i32>} : memref<8x32xf32, #tpu.memory_space<vmem>>, vector<8x32xf32>,
    %c0_6 = arith.constant 0 : index
    %c0_7 = arith.constant 0 : index
    %5 = vector.load %arg4[%c0_6, %c0_7] : memref<32x8xf32, #tpu.memory_space<vmem>>, vector<32x8xf32>
    tpu.vector_store %arg4[%c0_6, %c0_7], %3 {strides = array<i32>} : memref<32x8xf32, #tpu.memory_space<vmem>>, vector<32x8xf32>,
    return
  }
  func.func @transform_0(%arg0: i32) -> (i32, i32) {
    %c0_i32 = arith.constant 0 : i32
    %c0_i32_0 = arith.constant 0 : i32
    return %arg0, %c0_i32 : i32, i32
  }
  func.func @transform_1(%arg0: i32) -> (i32, i32) {
    %c0_i32 = arith.constant 0 : i32
    %c0_i32_0 = arith.constant 0 : i32
    %c0_i32_1 = arith.constant 0 : i32
    return %c0_i32, %c0_i32_0 : i32, i32
  }
  func.func @transform_2(%arg0: i32) -> (i32, i32) {
    %c0_i32 = arith.constant 0 : i32
    %c0_i32_0 = arith.constant 0 : i32
    return %arg0, %c0_i32 : i32, i32
  }
  func.func @transform_3(%arg0: i32) -> (i32, i32) {
    %c0_i32 = arith.constant 0 : i32
    %c0_i32_0 = arith.constant 0 : i32
    return %c0_i32, %arg0 : i32, i32
  }
}

</mosaic_0001>

<bundles_post_ra>
// kernel: tpu_custom_call.1
= control target key start
LH: loop header
LB: loop body
LE: loop exit
PB: predicated region body
PF: predicated region fallthrough
CT: control target
= control target key end

     0   :  { %9 = vsyncpa [#allocation3], 0  ;;  %s470_s0 = inlined_call_operand.hbm [shape: f32[8,32], index: 0, kind: input, shape index: {}]   ;;  %s471_s1 = inlined_call_operand.hbm [shape: f32[32,32], index: 1, kind: input, shape index: {}]   ;;  %s472_s2 = inlined_call_operand.hbm [shape: f32[8,32], index: 2, kind: output, shape index: {0}]   ;;  %s473_s3 = inlined_call_operand.vmem [shape: f32[32,8], index: 3, kind: output, shape index: {1}]  }
   0x1   :  { %10 = vsyncpa [#allocation6], 0 }
   0x2   :  { %11 = vsyncpa [#allocation4], 0  ;;  %s369_s12 = smov [#allocation2]   ;;  %s370_s14 = smov [#allocation5]  }
   0x3   :  { %s18_s13 = sshll.u32 %s369_s12, 4  ;;  %s27_s15 = sshll.u32 %s370_s14, 4  ;;  %s19_s13 = int_to_ptr.vmem [resolvable:$true] %s18_s13  ;;  %s397_s15 = int_to_ptr.vmem [resolvable:$true] %s27_s15 }
   0x4   :  { %s297_s18 = scalar_lea.hbm %s470_s0, 128 }
   0x5   :  { %p298_p0 = scmp.ne.s32.totalorder %s470_s0, %s297_s18  ;;  %p301_p1 = scmp.lt.u32.totalorder %s297_s18, %s470_s0 }
   0x7   :  { %p303_p2 = pnand %p301_p1, %p298_p0 }
   0x9   :  { %306 = shalt.err (!%p303_p2)
}
   0xa   :  { %s307_s23 = scalar_lea.vmem %s19_s13, 128  ;;  %p312_p4 = scmp.lt.s32.totalorder %s19_s13, %s19_s13 }
   0xb   :  { %p308_p3 = scmp.ne.s32.totalorder %s19_s13, %s307_s23  ;;  %p313_p5 = scmp.lt.s32.totalorder %s307_s23, %s307_s23 }
   0xd   :  { %p314_p6 = por %p313_p5, %p312_p4 }
   0xf   :  { %p315_p7 = pnand %p314_p6, %p308_p3 }
  0x11   :  { %318 = shalt.err (!%p315_p7)
}
  0x12   :  { %21 = dma.hbm_to_vmem [thread:$0]  %s470_s0, 128, %s19_s13, [#allocation3]  }
  0x13   :  { %s319_s28 = scalar_lea.hbm %s471_s1, 512 }
  0x14   :  { %p320_p8 = scmp.ne.s32.totalorder %s471_s1, %s319_s28  ;;  %p323_p9 = scmp.lt.u32.totalorder %s319_s28, %s471_s1 }
  0x16   :  { %p325_p10 = pnand %p323_p9, %p320_p8 }
  0x18   :  { %328 = shalt.err (!%p325_p10)
}
  0x19   :  { %s329_s6 = scalar_lea.vmem %s397_s15, 512  ;;  %p334_p12 = scmp.lt.s32.totalorder %s397_s15, %s397_s15 }
  0x1a   :  { %p330_p11 = scmp.ne.s32.totalorder %s397_s15, %s329_s6  ;;  %p335_p13 = scmp.lt.s32.totalorder %s329_s6, %s329_s6 }
  0x1c   :  { %p336_p0 = por %p335_p13, %p334_p12 }
  0x1e   :  { %p337_p1 = pnand %p336_p0, %p330_p11 }
  0x20   :  { %340 = shalt.err (!%p337_p1)
}
  0x21   :  { %s371_s0 = smov 128   ;;  %s372_s7 = smov 8  }
  0x22   :  { %33 = dma.hbm_to_vmem [thread:$0]  %s471_s1, 512, %s397_s15, [#allocation6], %s371_s0, %s371_s0, %s372_s7  }
  0x23   :  { %363 = dma.done.wait [#allocation3], 128  }
  0x24   :  { %364 = vsyncadd [#allocation3], 4294967168 }
  0x25   :  { %365 = dma.done.wait [#allocation6], 512  }
  0x26   :  { %366 = vsyncadd [#allocation6], 4294966784  ;;  %v373_v0 = vmov 0.0|0.0   ;;  %vm374_vm0 = vmmov 0   ;;  %v375_v1 = vmov 0.0   ;;  %vm45_vm1 = vcmask 261120  }
  0x27   :  { %281 = vmatprep.subr.bf16.mxu0 %v373_v0  ;;  %270 = vmatprep.mubr.msk.f32.mxu0 %vm374_vm0, %v375_v1  ;;  %vm430_vm2 = vmpackc.low %vm45_vm1, %vm45_vm1  ;;  %v41_v3 = vld [vmem:[#allocation5] sm:$0xff]  ;;  %v42_v4 = vld [vmem:[#allocation5 + $0x8] sm:$0xff]  ;;  %vm217_vm3 = vcmask 64512   ;;  %s376_s17 = smov [#allocation7]  }
  0x28   :  { %v40_v5 = vld [vmem:[#allocation2] sm:$0xff]  ;;  %v282_v6 = vpack.c.bf16 %v42_v4, %v41_v3  ;;  %275 = vmatprep.mubr.msk.f32.mxu1 %vm45_vm1, %v41_v3  ;;  %v43_v7 = vld [vmem:[#allocation5 + $0x10] sm:$0xff]  ;;  %s228_s18 = sshll.u32 %s376_s17, 4  ;;  %s229_s18 = int_to_ptr.vmem [resolvable:$true] %s228_s18 }
  0x29   :  { %273 = vmatprep.subr.msk.mxu1 %vm45_vm1, %v40_v5  ;;  %v44_v8 = vld [vmem:[#allocation5 + $0x18] sm:$0xff]  ;;  %s341_s19 = scalar_lea.vmem %s229_s18, 128  ;;  %p346_p3 = scmp.lt.s32.totalorder %s229_s18, %s229_s18 }
  0x2a   :  { %274 = vmatpush3.xpose.msk.msra.mxu1 %vm45_vm1, %v40_v5  ;;  %284 = vmatpush3.bf16.xpose.msk.msra.mxu0 %vm430_vm2, %v282_v6  ;;  %v286_v9 = vpack.c.bf16 %v44_v8, %v43_v7  ;;  %p342_p2 = scmp.ne.s32.totalorder %s229_s18, %s341_s19  ;;  %p347_p4 = scmp.lt.s32.totalorder %s341_s19, %s341_s19 }
  0x2b   :  { %285 = vmatprep.subr.bf16.mxu0 %v373_v0 }
  0x2c   :  { %p348_p5 = por %p347_p4, %p346_p3 }
  0x2d   :  { %276 = vmatmul.mubr.msk.f32.vlgmr.msra.gmra.mrb[0].mxu1 %vm45_vm1, %v42_v4 }
  0x2e   :  { %278 = vmatprep.mubr.msk.f32.mxu1 %vm45_vm1, %v43_v7  ;;  %p349_p6 = pnand %p348_p5, %p342_p2 }
  0x31   :  { %279 = vmatmul.mubr.msk.f32.gmra.mrb[2].mxu1 %vm45_vm1, %v44_v8 }
  0x32   :  { %288 = vmatpush3.bf16.xpose.msk.msra.mxu0 %vm430_vm2, %v286_v9 }
  0x39   :  { %271 = vmatmul.mubr.msk.f32.vlgmr.msra.gmra.mrb[0].mxu0 %vm45_vm1, %v40_v5 }
 0x100   :  { %v277_v10 = vpop.f32.mrb[0].mxu1 }
 0x101   :  { %219 = vst.msk [vmem:[%s473_s3 + $0x8] sm:$0xff] %vm217_vm3, %v277_v10  ;;  %v197_v11 = vpop.f32.mrb[1].mxu1 }
 0x102   :  { %218 = vst.msk [vmem:[%s473_s3] sm:$0xff] %vm217_vm3, %v197_v11 }
 0x104   :  { %v280_v12 = vpop.f32.mrb[2].mxu1 }
 0x105   :  { %221 = vst.msk [vmem:[%s473_s3 + $0x18] sm:$0xff] %vm217_vm3, %v280_v12  ;;  %v207_v13 = vpop.f32.mrb[3].mxu1 }
 0x106   :  { %220 = vst.msk [vmem:[%s473_s3 + $0x10] sm:$0xff] %vm217_vm3, %v207_v13 }
 0x10c   :  { %v127_v14 = vpop.f32.mrb[0].mxu0 }
 0x10d   :  { %216 = vst.msk [vmem:[#allocation7] sm:$0xff] %vm45_vm1, %v127_v14  ;;  %v272_v15 = vpop.f32.mrb[1].mxu0 }
 0x10e   :  { %352 = shalt.err (!%p349_p6)
}
 0x10f   :  { %s353_s22 = scalar_lea.hbm %s472_s2, 128 }
 0x110   :  { %p354_p7 = scmp.ne.s32.totalorder %s472_s2, %s353_s22  ;;  %p357_p8 = scmp.lt.u32.totalorder %s353_s22, %s472_s2 }
 0x112   :  { %p359_p9 = pnand %p357_p8, %p354_p7 }
 0x114   :  { %362 = shalt.err (!%p359_p9)
}
 0x115   :  { %231 = dma.vmem_to_hbm [thread:$0]  %s229_s18, 128, %s472_s2, [#allocation4]  }
 0x116   :  { %367 = dma.done.wait [#allocation4], 128  }
 0x117   :  { %368 = vsyncadd [#allocation4], 4294967168 }
 0x118   :  { %239 = vsyncpa [#allocation3], 1 }
 0x119   :  { %240 = vsyncpa [#allocation6], 1 }
 0x11a   :  { %241 = vsyncpa [#allocation4], 1 }

</bundles_post_ra>
